<compile_context>
chip_gen: v6e
topology: v6e:2x2x1
jax: 0.10.0
libtpu: 0.0.40
codegen_flags: <defaults>
</compile_context>

<pallas_src>
import jax
import jax.numpy as jnp
from jax.experimental import pallas as pl
from jax.experimental.pallas import tpu as pltpu

P_DROP = 0.5
SCALE = 1.0 / (1.0 - P_DROP)                        # inverted-dropout scale = 2.0
KEEP_THRESHOLD = int((1.0 - P_DROP) * (1 << 32))    # uint32 threshold (uses all 32 bits)


def dropout_add_kernel(x_ref, b1_ref, b2_ref, o_ref):
    x = x_ref[...]
    thresh = jnp.uint32(KEEP_THRESHOLD)
    # Bernoulli(keep = 1 - P_DROP) keep masks via full-word threshold compare.
    keep1 = (b1_ref[...] < thresh).astype(x.dtype)
    keep2 = (b2_ref[...] < thresh).astype(x.dtype)
    # dropout(x) + dropout(x) == x * (keep1 + keep2) * scale
    o_ref[...] = x * ((keep1 + keep2) * jnp.asarray(SCALE, x.dtype))


def dropout_add(x, key):
    # Two independent masks, matching the two dropout calls in the forward.
    # Caller supplies a fresh key per step (PyTorch reseeds dropout each call).
    k1, k2 = jax.random.split(key)
    bits1 = jax.random.bits(k1, x.shape, dtype=jnp.uint32)
    bits2 = jax.random.bits(k2, x.shape, dtype=jnp.uint32)

    vmem = pl.BlockSpec(memory_space=pltpu.MemorySpace.VMEM)
    return pl.pallas_call(
        dropout_add_kernel,
        out_shape=jax.ShapeDtypeStruct(x.shape, x.dtype),
        in_specs=[vmem, vmem, vmem],
        out_specs=vmem,
    )(x, bits1, bits2)


if __name__ == "__main__":
    key = jax.random.PRNGKey(0)
    kx, kmask = jax.random.split(key)
    # Shape implied by the module's usage: x ~ randn(1, 2, 2)
    x = jax.random.normal(kx, (1, 2, 2), dtype=jnp.float32)

    y = dropout_add(x, kmask)
    jax.block_until_ready(y)

    assert y.shape == x.shape and y.dtype == x.dtype
    # Each output element must be x * {0, 2, 4} (drop/drop, keep/drop, keep/keep).
    ratios = jnp.where(x != 0, y / x, 0.0)
    ok = jnp.all(
        (jnp.abs(ratios - 0.0) < 1e-5)
        | (jnp.abs(ratios - 2.0) < 1e-5)
        | (jnp.abs(ratios - 4.0) < 1e-5)
    )
    assert bool(ok)
    print("KERNEL_OK")
</pallas_src>

<mosaic_0001>
module attributes {stable_mosaic.version = 11 : i64} {
  func.func @dropout_add_kernel(%arg0: memref<1x2x2xf32, #tpu.memory_space<vmem>>, %arg1: memref<1x2x2xi32, #tpu.memory_space<vmem>>, %arg2: memref<1x2x2xi32, #tpu.memory_space<vmem>>, %arg3: memref<1x2x2xf32, #tpu.memory_space<vmem>>) attributes {dimension_semantics = [], scalar_prefetch = 0 : i64, scratch_operands = 0 : i64, tpu.core_type = #tpu.core_type<tc>} {
    %c0 = arith.constant 0 : index
    %c0_0 = arith.constant 0 : index
    %c0_1 = arith.constant 0 : index
    %0 = vector.load %arg0[%c0, %c0_0, %c0_1] : memref<1x2x2xf32, #tpu.memory_space<vmem>>, vector<1x2x2xf32>
    %c0_2 = arith.constant 0 : index
    %c0_3 = arith.constant 0 : index
    %c0_4 = arith.constant 0 : index
    %1 = vector.load %arg1[%c0_2, %c0_3, %c0_4] : memref<1x2x2xi32, #tpu.memory_space<vmem>>, vector<1x2x2xi32>
    %c-2147483648_i32 = arith.constant -2147483648 : i32
    %2 = vector.broadcast %c-2147483648_i32 : i32 to vector<1x2x2xi32>
    %3 = arith.cmpi ult, %1, %2 : vector<1x2x2xi32>
    %4 = arith.extui %3 : vector<1x2x2xi1> to vector<1x2x2xi32>
    %5 = arith.sitofp %4 : vector<1x2x2xi32> to vector<1x2x2xf32>
    %c0_5 = arith.constant 0 : index
    %c0_6 = arith.constant 0 : index
    %c0_7 = arith.constant 0 : index
    %6 = vector.load %arg2[%c0_5, %c0_6, %c0_7] : memref<1x2x2xi32, #tpu.memory_space<vmem>>, vector<1x2x2xi32>
    %c-2147483648_i32_8 = arith.constant -2147483648 : i32
    %7 = vector.broadcast %c-2147483648_i32_8 : i32 to vector<1x2x2xi32>
    %8 = arith.cmpi ult, %6, %7 : vector<1x2x2xi32>
    %9 = arith.extui %8 : vector<1x2x2xi1> to vector<1x2x2xi32>
    %10 = arith.sitofp %9 : vector<1x2x2xi32> to vector<1x2x2xf32>
    %11 = arith.addf %5, %10 : vector<1x2x2xf32>
    %cst = arith.constant 2.000000e+00 : f32
    %12 = vector.broadcast %cst : f32 to vector<1x2x2xf32>
    %13 = arith.mulf %11, %12 : vector<1x2x2xf32>
    %14 = arith.mulf %0, %13 : vector<1x2x2xf32>
    %c0_9 = arith.constant 0 : index
    %c0_10 = arith.constant 0 : index
    %c0_11 = arith.constant 0 : index
    %15 = vector.load %arg3[%c0_9, %c0_10, %c0_11] : memref<1x2x2xf32, #tpu.memory_space<vmem>>, vector<1x2x2xf32>
    tpu.vector_store %arg3[%c0_9, %c0_10, %c0_11], %14 {strides = array<i32>} : memref<1x2x2xf32, #tpu.memory_space<vmem>>, vector<1x2x2xf32>,
    return
  }
}

</mosaic_0001>

<bundles_post_ra>
// kernel: tpu_custom_call.1
= control target key start
LH: loop header
LB: loop body
LE: loop exit
PB: predicated region body
PF: predicated region fallthrough
CT: control target
= control target key end

     0   :  { %8 = vsyncpa [#allocation3], 0  ;;  %s177_s0 = inlined_call_operand.hbm [shape: f32[1,2,2], index: 0, kind: input, shape index: {}]   ;;  %s178_s1 = inlined_call_operand.hbm [shape: u32[1,2,2], index: 1, kind: input, shape index: {}]   ;;  %s179_s2 = inlined_call_operand.vmem [shape: u32[1,2,2], index: 2, kind: input, shape index: {}]   ;;  %s180_s3 = inlined_call_operand.hbm [shape: f32[1,2,2], index: 3, kind: output, shape index: {}]  }
   0x1   :  { %9 = vsyncpa [#allocation6], 0 }
   0x2   :  { %10 = vsyncpa [#allocation4], 0  ;;  %s141_s12 = smov [#allocation2]   ;;  %s142_s14 = smov [#allocation5]  }
   0x3   :  { %s17_s13 = sshll.u32 %s141_s12, 4  ;;  %s27_s15 = sshll.u32 %s142_s14, 4  ;;  %s18_s13 = int_to_ptr.vmem [resolvable:$true] %s17_s13  ;;  %s28_s15 = int_to_ptr.vmem [resolvable:$true] %s27_s15 }
   0x4   :  { %s83_s16 = scalar_lea.vmem %s18_s13, 32  ;;  %p88_p1 = scmp.lt.s32.totalorder %s18_s13, %s18_s13 }
   0x5   :  { %p84_p0 = scmp.ne.s32.totalorder %s18_s13, %s83_s16  ;;  %p89_p2 = scmp.lt.s32.totalorder %s83_s16, %s83_s16 }
   0x7   :  { %p90_p3 = por %p89_p2, %p88_p1 }
   0x9   :  { %p91_p4 = pnand %p90_p3, %p84_p0 }
   0xb   :  { %94 = shalt.err (!%p91_p4)
}
   0xc   :  { %20 = dma.hbm_to_vmem [thread:$0]  %s177_s0, 32, %s18_s13, [#allocation3]  }
   0xd   :  { %s103_s19 = scalar_lea.vmem %s28_s15, 32  ;;  %p108_p6 = scmp.lt.s32.totalorder %s28_s15, %s28_s15 }
   0xe   :  { %p104_p5 = scmp.ne.s32.totalorder %s28_s15, %s103_s19  ;;  %p109_p7 = scmp.lt.s32.totalorder %s103_s19, %s103_s19 }
  0x10   :  { %p110_p8 = por %p109_p7, %p108_p6 }
  0x12   :  { %p111_p9 = pnand %p110_p8, %p104_p5 }
  0x14   :  { %114 = shalt.err (!%p111_p9)
}
  0x15   :  { %30 = dma.hbm_to_vmem [thread:$0]  %s178_s1, 32, %s28_s15, [#allocation6]  }
  0x16   :  { %135 = dma.done.wait [#allocation3], 32  }
  0x17   :  { %136 = vsyncadd [#allocation3], 4294967264 }
  0x18   :  { %137 = dma.done.wait [#allocation6], 32  }
  0x19   :  { %138 = vsyncadd [#allocation6], 4294967264  ;;  %v40_v0 = vld [vmem:[#allocation5] sm:$0x3]  ;;  %v44_v1 = vld [vmem:[%s179_s2] sm:$0x3] }
  0x1a   :  { %vm41_vm0 = vcmp.lt.u32.totalorder %v40_v0, 2147483648  ;;  %vm45_vm1 = vcmp.lt.u32.totalorder %v44_v1, 2147483648  ;;  %v143_v2 = vmov 0.0   ;;  %v39_v6 = vld [vmem:[#allocation2] sm:$0x3]  ;;  %s144_s0 = smov [#allocation7]  }
  0x1b   :  { %v69_v3 = vsel %vm41_vm0, 1.0, %v143_v2  ;;  %v70_v4 = vsel %vm45_vm1, 1.0, %v143_v2  ;;  %s59_s24 = sshll.u32 %s144_s0, 4  ;;  %vm51_vm2 = vcmask 9216   ;;  %s60_s24 = int_to_ptr.vmem [resolvable:$true] %s59_s24 }
  0x1c   :  { %v48_v5 = vadd.f32 %v70_v4, %v69_v3  ;;  %s115_s1 = scalar_lea.vmem %s60_s24, 32  ;;  %p120_p11 = scmp.lt.s32.totalorder %s60_s24, %s60_s24 }
  0x1d   :  { %p116_p10 = scmp.ne.s32.totalorder %s60_s24, %s115_s1  ;;  %p121_p12 = scmp.lt.s32.totalorder %s115_s1, %s115_s1 }
  0x1e   :  { %v49_v7 = vmul.f32 2.0, %v48_v5 }
  0x1f   :  { %p122_p13 = por %p121_p12, %p120_p11 }
  0x20   :  { %v50_v8 = vmul.f32 %v49_v7, %v39_v6 }
  0x21   :  { %p123_p0 = pnand %p122_p13, %p116_p10 }
  0x22   :  { %52 = vst.msk [vmem:[#allocation7] sm:$0x3] %vm51_vm2, %v50_v8 }
  0x23   :  { %126 = shalt.err (!%p123_p0)
}
  0x24   :  { %62 = dma.vmem_to_hbm [thread:$0]  %s60_s24, 32, %s180_s3, [#allocation4]  }
  0x25   :  { %139 = dma.done.wait [#allocation4], 32  }
  0x26   :  { %140 = vsyncadd [#allocation4], 4294967264 }
  0x27   :  { %66 = vsyncpa [#allocation3], 1 }
  0x28   :  { %67 = vsyncpa [#allocation6], 1 }
  0x29   :  { %68 = vsyncpa [#allocation4], 1 }

</bundles_post_ra>
